<compile_context>
chip_gen: v7x
topology: tpu7x:2x2x1
jax: 0.10.0
libtpu: 0.0.40
codegen_flags: <defaults>
</compile_context>

<pallas_src>
import jax
import jax.numpy as jnp
from jax.experimental import pallas as pl
from jax.experimental.pallas import tpu as pltpu


def _rnn_kernel(x_ref, wih_t_ref, whh_t_ref, b_rnn_ref, wfc_t_ref, b_fc_ref,
                out_ref):
    """one-hot -> batched input projection -> unrolled RNN -> FC -> ReLU -> softmax."""
    B, T = x_ref.shape
    I, H = wih_t_ref.shape          # wih_t is W_ih^T : (input_size, hidden)
    O = wfc_t_ref.shape[1]          # wfc_t is W_fc^T : (hidden, output)

    # ---- Input projection for ALL timesteps in one matmul -------------------
    iota_i = jax.lax.broadcasted_iota(jnp.int32, (B, I), 1)     # hoisted, reused T times
    x_all = x_ref[...]                                          # (B, T) int32
    onehots = []
    for t in range(T):
        idx_t = x_all[:, t:t + 1]                               # (B, 1) static lane slice
        onehots.append((iota_i == idx_t).astype(jnp.float32))   # (B, I)
    onehot_all = jnp.concatenate(onehots, axis=0)               # (T*B, I), t-major rows
    x_proj_all = (jnp.dot(onehot_all, wih_t_ref[...],
                          preferred_element_type=jnp.float32)
                  + b_rnn_ref[...])                             # (T*B, H), bias pre-summed

    # ---- Recurrence: h carried in registers, statically unrolled ------------
    whh_t = whh_t_ref[...]                                      # (H, H), loaded once
    h = jnp.zeros((B, H), jnp.float32)                          # h_0 = 0 (PyTorch default)
    for t in range(T):
        xp_t = jax.lax.slice(x_proj_all, (t * B, 0), ((t + 1) * B, H))   # (B, H)
        h = jnp.tanh(xp_t + jnp.dot(h, whh_t,
                                    preferred_element_type=jnp.float32))

    # ---- FC -> ReLU -> softmax over the class (lane) axis --------------------
    logits = (jnp.dot(h, wfc_t_ref[...], preferred_element_type=jnp.float32)
              + b_fc_ref[...])                                  # (B, O)
    act = jnp.maximum(logits, 0.0)
    m = jnp.max(act, axis=1, keepdims=True)
    e = jnp.exp(act - m)
    out_ref[...] = e / jnp.sum(e, axis=1, keepdims=True)        # (B, O)


@jax.jit
def rnn_network_forward(x, params):
    """x: (B, T) int32 token indices. Returns (B, output_size) float32 probs."""
    B, T = x.shape
    wih, whh = params["w_ih"], params["w_hh"]
    bih, bhh = params["b_ih"], params["b_hh"]
    wfc, bfc = params["w_fc"], params["b_fc"]
    H, I = wih.shape
    O = wfc.shape[0]

    # One-time, fused-under-jit prep: transposed weights + pre-summed RNN bias.
    wih_t = wih.T                       # (I, H)
    whh_t = whh.T                       # (H, H)
    wfc_t = wfc.T                       # (H, O)
    b_rnn = (bih + bhh).reshape(1, H)   # (1, H)
    b_fc = bfc.reshape(1, O)            # (1, O)

    return pl.pallas_call(
        _rnn_kernel,
        out_shape=jax.ShapeDtypeStruct((B, O), jnp.float32),
        in_specs=[pl.BlockSpec(memory_space=pltpu.MemorySpace.VMEM)] * 6,
        out_specs=pl.BlockSpec(memory_space=pltpu.MemorySpace.VMEM),
    )(x.astype(jnp.int32), wih_t, whh_t, b_rnn, wfc_t, b_fc)


def rnn_network_ref(x, params):
    """Pure-JAX reference matching the PyTorch module semantics."""
    B, T = x.shape
    wih, whh = params["w_ih"], params["w_hh"]
    bih, bhh = params["b_ih"], params["b_hh"]
    wfc, bfc = params["w_fc"], params["b_fc"]
    I = wih.shape[1]
    hi = jax.lax.Precision.HIGHEST
    onehot = jax.nn.one_hot(x, I, dtype=jnp.float32)            # (B, T, I)
    h = jnp.zeros((B, wih.shape[0]), jnp.float32)
    for t in range(T):
        h = jnp.tanh(jnp.dot(onehot[:, t], wih.T, precision=hi) + bih
                     + jnp.dot(h, whh.T, precision=hi) + bhh)
    out = jnp.maximum(jnp.dot(h, wfc.T, precision=hi) + bfc, 0.0)
    return jax.nn.softmax(out, axis=1)


if __name__ == "__main__":
    key = jax.random.PRNGKey(0)
    B, T = 4, 8
    input_size, hidden_dim, output_size = 32, 32, 16

    k = jax.random.split(key, 7)
    bound = 1.0 / (hidden_dim ** 0.5)   # PyTorch-style U(-1/sqrt(H), 1/sqrt(H)) init
    params = {
        "w_ih": jax.random.uniform(k[0], (hidden_dim, input_size), jnp.float32, -bound, bound),
        "w_hh": jax.random.uniform(k[1], (hidden_dim, hidden_dim), jnp.float32, -bound, bound),
        "b_ih": jax.random.uniform(k[2], (hidden_dim,), jnp.float32, -bound, bound),
        "b_hh": jax.random.uniform(k[3], (hidden_dim,), jnp.float32, -bound, bound),
        "w_fc": jax.random.uniform(k[4], (output_size, hidden_dim), jnp.float32, -bound, bound),
        "b_fc": jax.random.uniform(k[5], (output_size,), jnp.float32, -bound, bound),
    }
    x = jax.random.randint(k[6], (B, T), 0, input_size, dtype=jnp.int32)

    out = jax.block_until_ready(rnn_network_forward(x, params))
    ref = rnn_network_ref(x, params)

    assert out.shape == (B, output_size)
    assert bool(jnp.allclose(out, ref, atol=1e-5, rtol=1e-5))
    print("KERNEL_OK")
</pallas_src>

<mosaic_0001>
module attributes {stable_mosaic.version = 11 : i64} {
  func.func @_rnn_kernel(%arg0: memref<4x8xi32, #tpu.memory_space<vmem>>, %arg1: memref<32x32xf32, #tpu.memory_space<vmem>>, %arg2: memref<32x32xf32, #tpu.memory_space<vmem>>, %arg3: memref<1x32xf32, #tpu.memory_space<vmem>>, %arg4: memref<32x16xf32, #tpu.memory_space<vmem>>, %arg5: memref<1x16xf32, #tpu.memory_space<vmem>>, %arg6: memref<4x16xf32, #tpu.memory_space<vmem>>) attributes {dimension_semantics = [], scalar_prefetch = 0 : i64, scratch_operands = 0 : i64, tpu.core_type = #tpu.core_type<tc>} {
    %0 = tpu.iota {dimensions = array<i32: 1>} : vector<4x32xi32>
    %c0 = arith.constant 0 : index
    %c0_0 = arith.constant 0 : index
    %1 = vector.load %arg0[%c0, %c0_0] : memref<4x8xi32, #tpu.memory_space<vmem>>, vector<4x8xi32>
    %2 = vector.extract_strided_slice %1 {offsets = [0, 0], sizes = [4, 1], strides = [1, 1]} : vector<4x8xi32> to vector<4x1xi32>
    %3 = vector.broadcast %2 : vector<4x1xi32> to vector<4x32xi32>
    %4 = arith.cmpi eq, %0, %3 : vector<4x32xi32>
    %5 = arith.extui %4 : vector<4x32xi1> to vector<4x32xi32>
    %6 = arith.sitofp %5 : vector<4x32xi32> to vector<4x32xf32>
    %7 = vector.extract_strided_slice %1 {offsets = [0, 1], sizes = [4, 1], strides = [1, 1]} : vector<4x8xi32> to vector<4x1xi32>
    %8 = vector.broadcast %7 : vector<4x1xi32> to vector<4x32xi32>
    %9 = arith.cmpi eq, %0, %8 : vector<4x32xi32>
    %10 = arith.extui %9 : vector<4x32xi1> to vector<4x32xi32>
    %11 = arith.sitofp %10 : vector<4x32xi32> to vector<4x32xf32>
    %12 = vector.extract_strided_slice %1 {offsets = [0, 2], sizes = [4, 1], strides = [1, 1]} : vector<4x8xi32> to vector<4x1xi32>
    %13 = vector.broadcast %12 : vector<4x1xi32> to vector<4x32xi32>
    %14 = arith.cmpi eq, %0, %13 : vector<4x32xi32>
    %15 = arith.extui %14 : vector<4x32xi1> to vector<4x32xi32>
    %16 = arith.sitofp %15 : vector<4x32xi32> to vector<4x32xf32>
    %17 = vector.extract_strided_slice %1 {offsets = [0, 3], sizes = [4, 1], strides = [1, 1]} : vector<4x8xi32> to vector<4x1xi32>
    %18 = vector.broadcast %17 : vector<4x1xi32> to vector<4x32xi32>
    %19 = arith.cmpi eq, %0, %18 : vector<4x32xi32>
    %20 = arith.extui %19 : vector<4x32xi1> to vector<4x32xi32>
    %21 = arith.sitofp %20 : vector<4x32xi32> to vector<4x32xf32>
    %22 = vector.extract_strided_slice %1 {offsets = [0, 4], sizes = [4, 1], strides = [1, 1]} : vector<4x8xi32> to vector<4x1xi32>
    %23 = vector.broadcast %22 : vector<4x1xi32> to vector<4x32xi32>
    %24 = arith.cmpi eq, %0, %23 : vector<4x32xi32>
    %25 = arith.extui %24 : vector<4x32xi1> to vector<4x32xi32>
    %26 = arith.sitofp %25 : vector<4x32xi32> to vector<4x32xf32>
    %27 = vector.extract_strided_slice %1 {offsets = [0, 5], sizes = [4, 1], strides = [1, 1]} : vector<4x8xi32> to vector<4x1xi32>
    %28 = vector.broadcast %27 : vector<4x1xi32> to vector<4x32xi32>
    %29 = arith.cmpi eq, %0, %28 : vector<4x32xi32>
    %30 = arith.extui %29 : vector<4x32xi1> to vector<4x32xi32>
    %31 = arith.sitofp %30 : vector<4x32xi32> to vector<4x32xf32>
    %32 = vector.extract_strided_slice %1 {offsets = [0, 6], sizes = [4, 1], strides = [1, 1]} : vector<4x8xi32> to vector<4x1xi32>
    %33 = vector.broadcast %32 : vector<4x1xi32> to vector<4x32xi32>
    %34 = arith.cmpi eq, %0, %33 : vector<4x32xi32>
    %35 = arith.extui %34 : vector<4x32xi1> to vector<4x32xi32>
    %36 = arith.sitofp %35 : vector<4x32xi32> to vector<4x32xf32>
    %37 = vector.extract_strided_slice %1 {offsets = [0, 7], sizes = [4, 1], strides = [1, 1]} : vector<4x8xi32> to vector<4x1xi32>
    %38 = vector.broadcast %37 : vector<4x1xi32> to vector<4x32xi32>
    %39 = arith.cmpi eq, %0, %38 : vector<4x32xi32>
    %40 = arith.extui %39 : vector<4x32xi1> to vector<4x32xi32>
    %41 = arith.sitofp %40 : vector<4x32xi32> to vector<4x32xf32>
    %42 = tpu.concatenate %6, %11, %16, %21, %26, %31, %36, %41 in 0 : vector<4x32xf32>, vector<4x32xf32>, vector<4x32xf32>, vector<4x32xf32>, vector<4x32xf32>, vector<4x32xf32>, vector<4x32xf32>, vector<4x32xf32> -> vector<32x32xf32>
    %c0_1 = arith.constant 0 : index
    %c0_2 = arith.constant 0 : index
    %43 = vector.load %arg1[%c0_1, %c0_2] : memref<32x32xf32, #tpu.memory_space<vmem>>, vector<32x32xf32>
    %cst = arith.constant dense<0.000000e+00> : vector<32x32xf32>
    %44 = tpu.matmul %42, %43, %cst {dimension_numbers = #tpu.dot_dimension_numbers<[1], [0], [0], [1], [0, 0, 1, 1], [], []>} : vector<32x32xf32>, vector<32x32xf32>, vector<32x32xf32> -> vector<32x32xf32>
    %c0_3 = arith.constant 0 : index
    %c0_4 = arith.constant 0 : index
    %45 = vector.load %arg3[%c0_3, %c0_4] : memref<1x32xf32, #tpu.memory_space<vmem>>, vector<1x32xf32>
    %46 = vector.broadcast %45 : vector<1x32xf32> to vector<32x32xf32>
    %47 = arith.addf %44, %46 : vector<32x32xf32>
    %c0_5 = arith.constant 0 : index
    %c0_6 = arith.constant 0 : index
    %48 = vector.load %arg2[%c0_5, %c0_6] : memref<32x32xf32, #tpu.memory_space<vmem>>, vector<32x32xf32>
    %cst_7 = arith.constant 0.000000e+00 : f32
    %49 = vector.broadcast %cst_7 : f32 to vector<4x32xf32>
    %50 = vector.extract_strided_slice %47 {offsets = [0, 0], sizes = [4, 32], strides = [1, 1]} : vector<32x32xf32> to vector<4x32xf32>
    %cst_8 = arith.constant dense<0.000000e+00> : vector<4x32xf32>
    %51 = tpu.matmul %49, %48, %cst_8 {dimension_numbers = #tpu.dot_dimension_numbers<[1], [0], [0], [1], [0, 0, 1, 1], [], []>} : vector<4x32xf32>, vector<32x32xf32>, vector<4x32xf32> -> vector<4x32xf32>
    %52 = arith.addf %50, %51 : vector<4x32xf32>
    %53 = math.tanh %52 : vector<4x32xf32>
    %54 = vector.extract_strided_slice %47 {offsets = [4, 0], sizes = [4, 32], strides = [1, 1]} : vector<32x32xf32> to vector<4x32xf32>
    %cst_9 = arith.constant dense<0.000000e+00> : vector<4x32xf32>
    %55 = tpu.matmul %53, %48, %cst_9 {dimension_numbers = #tpu.dot_dimension_numbers<[1], [0], [0], [1], [0, 0, 1, 1], [], []>} : vector<4x32xf32>, vector<32x32xf32>, vector<4x32xf32> -> vector<4x32xf32>
    %56 = arith.addf %54, %55 : vector<4x32xf32>
    %57 = math.tanh %56 : vector<4x32xf32>
    %58 = vector.extract_strided_slice %47 {offsets = [8, 0], sizes = [4, 32], strides = [1, 1]} : vector<32x32xf32> to vector<4x32xf32>
    %cst_10 = arith.constant dense<0.000000e+00> : vector<4x32xf32>
    %59 = tpu.matmul %57, %48, %cst_10 {dimension_numbers = #tpu.dot_dimension_numbers<[1], [0], [0], [1], [0, 0, 1, 1], [], []>} : vector<4x32xf32>, vector<32x32xf32>, vector<4x32xf32> -> vector<4x32xf32>
    %60 = arith.addf %58, %59 : vector<4x32xf32>
    %61 = math.tanh %60 : vector<4x32xf32>
    %62 = vector.extract_strided_slice %47 {offsets = [12, 0], sizes = [4, 32], strides = [1, 1]} : vector<32x32xf32> to vector<4x32xf32>
    %cst_11 = arith.constant dense<0.000000e+00> : vector<4x32xf32>
    %63 = tpu.matmul %61, %48, %cst_11 {dimension_numbers = #tpu.dot_dimension_numbers<[1], [0], [0], [1], [0, 0, 1, 1], [], []>} : vector<4x32xf32>, vector<32x32xf32>, vector<4x32xf32> -> vector<4x32xf32>
    %64 = arith.addf %62, %63 : vector<4x32xf32>
    %65 = math.tanh %64 : vector<4x32xf32>
    %66 = vector.extract_strided_slice %47 {offsets = [16, 0], sizes = [4, 32], strides = [1, 1]} : vector<32x32xf32> to vector<4x32xf32>
    %cst_12 = arith.constant dense<0.000000e+00> : vector<4x32xf32>
    %67 = tpu.matmul %65, %48, %cst_12 {dimension_numbers = #tpu.dot_dimension_numbers<[1], [0], [0], [1], [0, 0, 1, 1], [], []>} : vector<4x32xf32>, vector<32x32xf32>, vector<4x32xf32> -> vector<4x32xf32>
    %68 = arith.addf %66, %67 : vector<4x32xf32>
    %69 = math.tanh %68 : vector<4x32xf32>
    %70 = vector.extract_strided_slice %47 {offsets = [20, 0], sizes = [4, 32], strides = [1, 1]} : vector<32x32xf32> to vector<4x32xf32>
    %cst_13 = arith.constant dense<0.000000e+00> : vector<4x32xf32>
    %71 = tpu.matmul %69, %48, %cst_13 {dimension_numbers = #tpu.dot_dimension_numbers<[1], [0], [0], [1], [0, 0, 1, 1], [], []>} : vector<4x32xf32>, vector<32x32xf32>, vector<4x32xf32> -> vector<4x32xf32>
    %72 = arith.addf %70, %71 : vector<4x32xf32>
    %73 = math.tanh %72 : vector<4x32xf32>
    %74 = vector.extract_strided_slice %47 {offsets = [24, 0], sizes = [4, 32], strides = [1, 1]} : vector<32x32xf32> to vector<4x32xf32>
    %cst_14 = arith.constant dense<0.000000e+00> : vector<4x32xf32>
    %75 = tpu.matmul %73, %48, %cst_14 {dimension_numbers = #tpu.dot_dimension_numbers<[1], [0], [0], [1], [0, 0, 1, 1], [], []>} : vector<4x32xf32>, vector<32x32xf32>, vector<4x32xf32> -> vector<4x32xf32>
    %76 = arith.addf %74, %75 : vector<4x32xf32>
    %77 = math.tanh %76 : vector<4x32xf32>
    %78 = vector.extract_strided_slice %47 {offsets = [28, 0], sizes = [4, 32], strides = [1, 1]} : vector<32x32xf32> to vector<4x32xf32>
    %cst_15 = arith.constant dense<0.000000e+00> : vector<4x32xf32>
    %79 = tpu.matmul %77, %48, %cst_15 {dimension_numbers = #tpu.dot_dimension_numbers<[1], [0], [0], [1], [0, 0, 1, 1], [], []>} : vector<4x32xf32>, vector<32x32xf32>, vector<4x32xf32> -> vector<4x32xf32>
    %80 = arith.addf %78, %79 : vector<4x32xf32>
    %81 = math.tanh %80 : vector<4x32xf32>
    %c0_16 = arith.constant 0 : index
    %c0_17 = arith.constant 0 : index
    %82 = vector.load %arg4[%c0_16, %c0_17] : memref<32x16xf32, #tpu.memory_space<vmem>>, vector<32x16xf32>
    %cst_18 = arith.constant dense<0.000000e+00> : vector<4x16xf32>
    %83 = tpu.matmul %81, %82, %cst_18 {dimension_numbers = #tpu.dot_dimension_numbers<[1], [0], [0], [1], [0, 0, 1, 1], [], []>} : vector<4x32xf32>, vector<32x16xf32>, vector<4x16xf32> -> vector<4x16xf32>
    %c0_19 = arith.constant 0 : index
    %c0_20 = arith.constant 0 : index
    %84 = vector.load %arg5[%c0_19, %c0_20] : memref<1x16xf32, #tpu.memory_space<vmem>>, vector<1x16xf32>
    %85 = vector.broadcast %84 : vector<1x16xf32> to vector<4x16xf32>
    %86 = arith.addf %83, %85 : vector<4x16xf32>
    %cst_21 = arith.constant 0.000000e+00 : f32
    %87 = vector.broadcast %cst_21 : f32 to vector<4x16xf32>
    %88 = arith.maximumf %86, %87 : vector<4x16xf32>
    %cst_22 = arith.constant dense<0xFF800000> : vector<4xf32>
    %89 = vector.multi_reduction <maximumf>, %88, %cst_22 [1] : vector<4x16xf32> to vector<4xf32>
    %90 = vector.shape_cast %89 : vector<4xf32> to vector<4x1xf32>
    %91 = vector.broadcast %90 : vector<4x1xf32> to vector<4x16xf32>
    %92 = arith.subf %88, %91 : vector<4x16xf32>
    %93 = math.exp %92 : vector<4x16xf32>
    %cst_23 = arith.constant dense<0.000000e+00> : vector<4xf32>
    %94 = vector.multi_reduction <add>, %93, %cst_23 [1] : vector<4x16xf32> to vector<4xf32>
    %95 = vector.shape_cast %94 : vector<4xf32> to vector<4x1xf32>
    %96 = vector.broadcast %95 : vector<4x1xf32> to vector<4x16xf32>
    %97 = arith.divf %93, %96 : vector<4x16xf32>
    %c0_24 = arith.constant 0 : index
    %c0_25 = arith.constant 0 : index
    %98 = vector.load %arg6[%c0_24, %c0_25] : memref<4x16xf32, #tpu.memory_space<vmem>>, vector<4x16xf32>
    tpu.vector_store %arg6[%c0_24, %c0_25], %97 {strides = array<i32>} : memref<4x16xf32, #tpu.memory_space<vmem>>, vector<4x16xf32>,
    return
  }
}

</mosaic_0001>

<bundles_post_ra>
// kernel: rnn_network_forward.1
= control target key start
LH: loop header
LB: loop body
LE: loop exit
PB: predicated region body
PF: predicated region fallthrough
CT: control target
= control target key end

     0   :  { %v1247_v1 = vmov 1   ;;  %v1248_v2 = vmov 0   ;;  %s1441_s0 = inlined_call_operand.vmem [shape: s32[4,8], index: 0, kind: input, shape index: {}]   ;;  %s1442_s1 = inlined_call_operand.vmem [shape: f32[32,32], index: 1, kind: input, shape index: {}]   ;;  %s1443_s2 = inlined_call_operand.vmem [shape: f32[32,32], index: 2, kind: input, shape index: {}]   ;;  %s1444_s3 = inlined_call_operand.vmem [shape: f32[1,32], index: 3, kind: input, shape index: {}]   ;;  %s1445_s4 = inlined_call_operand.vmem [shape: f32[32,16], index: 4, kind: input, shape index: {}]   ;;  %s1446_s5 = inlined_call_operand.vmem [shape: f32[1,16], index: 5, kind: input, shape index: {}]   ;;  %s1447_s6 = inlined_call_operand.hbm [shape: f32[4,16], index: 6, kind: output, shape index: {}]  }
   0x1   :  { %v26_v0 = vld [vmem:[%s1441_s0] sm:$0xf]  ;;  %1195 = vset.pattern.permute.xlu0 %v1247_v1  ;;  %1197 = vset.pattern.permute.xlu1 %v1248_v2  ;;  %v93_v4 = vld [vmem:[%s1442_s1 + $0x8] sm:$0xff] }
   0x2   :  { %v92_v3 = vld [vmem:[%s1442_s1] sm:$0xff] }
   0x3   :  { %11 = vsyncpa [#allocation3], 0  ;;  %34 = vperm.xlu0 %1195, %v26_v0   ;;  %28 = vperm.xlu1 %1197, %v26_v0   ;;  %v1121_v5 = vpack.c.bf16 %v93_v4, %v92_v3  ;;  %v201_v6 = vld [vmem:[%s1443_s2] sm:$0xff]  ;;  %v202_v7 = vld [vmem:[%s1443_s2 + $0x8] sm:$0xff]  ;;  %v1249_v8 = vmov 0.0|0.0   ;;  %v1250_v12 = vmov 3   ;;  %v24_v23 = vlaneseq }
   0x4   :  { %1129 = vmatprep.subr.bf16.mxu1 %v1249_v8  ;;  %v1310_v9 = vpack.c.bf16 %v202_v7, %v201_v6  ;;  %v94_v10 = vld [vmem:[%s1442_s1 + $0x10] sm:$0xff]  ;;  %v95_v11 = vld [vmem:[%s1442_s1 + $0x18] sm:$0xff]  ;;  %v1251_v13 = vmov 2   ;;  %vm1252_vm0 = vmmov 0   ;;  %v1253_v18 = vmov 0.0  }
   0x5   :  { %1122 = vmatprep.subr.bf16.mxu0 %v1121_v5  ;;  %v1125_v14 = vpack.c.bf16 %v95_v11, %v94_v10  ;;  %v203_v15 = vld [vmem:[%s1443_s2 + $0x10] sm:$0xff]  ;;  %v204_v16 = vld [vmem:[%s1443_s2 + $0x18] sm:$0xff]  ;;  %1030 = vmatprep.mubr.msk.f32.mxu1 %vm1252_vm0, %v1253_v18  ;;  %v1254_v19 = vmov 5   ;;  %v1255_v20 = vmov 7   ;;  %v1256_v21 = vmov 4  }
   0x6   :  { %1124 = vmatpush3.bf16.msra.mxu0 %v1121_v5  ;;  %1131 = vmatpush3.bf16.msra.mxu1 %v1310_v9  ;;  %v1326_v17 = vpack.c.bf16 %v204_v16, %v203_v15  ;;  %v1257_v22 = vmov 6   ;;  %v25_v24 = vand.u32 127, %v24_v23  ;;  %vm87_vm3 = vcmask 1043456   ;;  %v1365_v51 = vld [vmem:[%s1444_s3] ss:$0 sm:$0xff] }
   0x7   :  { %1196 = vset.pattern.permute.xlu0 %v1250_v12  ;;  %1198 = vset.pattern.permute.xlu1 %v1251_v13  ;;  %vm103_vm4 = vcmask 261120   ;;  %vm906_vm11 = vcmask 125952  }
   0x8   :  { %46 = vperm.xlu0 %1196, %v26_v0   ;;  %40 = vperm.xlu1 %1198, %v26_v0  }
   0x9   :  { %1126 = vmatprep.subr.bf16.mxu0 %v1125_v14  ;;  %1132 = vmatprep.subr.bf16.mxu1 %v1249_v8 }
   0xa   :  { %1128 = vmatpush3.bf16.msra.mxu0 %v1125_v14  ;;  %1134 = vmatpush3.bf16.msra.mxu1 %v1326_v17 }
   0xb   :  { %1135 = vmatprep.subr.bf16.mxu0 %v1249_v8  ;;  %1141 = vmatprep.subr.bf16.mxu1 %v1249_v8 }
   0xc   :  { %1199 = vset.pattern.permute.xlu1 %v1254_v19  ;;  %1200 = vset.pattern.permute.xlu0 %v1255_v20 }
   0xd   :  { %58 = vperm.xlu1 %1199, %v26_v0   ;;  %1031 = vmatmul.mubr.f32.vlgmr.msra.gmra.mrb[0].mxu1 %v1253_v18 }
   0xe   :  { %70 = vperm.xlu0 %1200, %v26_v0   ;;  %1052 = vmatprep.mubr.msk.f32.mxu1 %vm1252_vm0, %v1253_v18 }
   0xf   :  { %1143 = vmatpush3.bf16.msra.mxu1 %v1310_v9 }
  0x10   :  { %1144 = vmatprep.subr.bf16.mxu1 %v1249_v8 }
  0x11   :  { %1201 = vset.pattern.permute.xlu1 %v1256_v21 }
  0x12   :  { %52 = vperm.xlu1 %1201, %v26_v0  }
  0x13   :  { %1146 = vmatpush3.bf16.msra.mxu1 %v1326_v17 }
  0x14   :  { %1153 = vmatprep.subr.bf16.mxu1 %v1249_v8 }
  0x16   :  { %1202 = vset.pattern.permute.xlu1 %v1257_v22 }
  0x17   :  { %64 = vperm.xlu1 %1202, %v26_v0  }
  0x82   :  { %v35_v25 = vpop.permute.xlu0 %34  ;;  %v29_v26 = vpop.permute.xlu1 %28 }
  0x83   :  { %vm36_vm1 = vcmp.eq.s32.totalorder %v25_v24, %v35_v25  ;;  %vm30_vm2 = vcmp.eq.s32.totalorder %v25_v24, %v29_v26 }
  0x84   :  { %v934_v27 = vsel %vm36_vm1, 1.0, %v1253_v18  ;;  %v933_v28 = vsel %vm30_vm2, 1.0, %v1253_v18 }
  0x85   :  { %v76_v29 = vrot.slane %v934_v27, 4 }
  0x87   :  { %v47_v30 = vpop.permute.xlu0 %46  ;;  %v88_v31 = vsel %vm87_vm3, %v933_v28, %v76_v29  ;;  %v41_v32 = vpop.permute.xlu1 %40 }
  0x88   :  { %vm48_vm5 = vcmp.eq.s32.totalorder %v25_v24, %v47_v30  ;;  %1016 = vmatprep.mubr.msk.f32.mxu0 %vm103_vm4, %v88_v31  ;;  %vm42_vm6 = vcmp.eq.s32.totalorder %v25_v24, %v41_v32  ;;  %v821_v31 = vld [vmem:[%s1445_s4 + $0x8] sm:$0xff] }
  0x89   :  { %v936_v33 = vsel %vm48_vm5, 1.0, %v1253_v18  ;;  %v935_v34 = vsel %vm42_vm6, 1.0, %v1253_v18 }
  0x8a   :  { %v79_v35 = vrot.slane %v936_v33, 4  ;;  %v823_v33 = vld [vmem:[%s1445_s4 + $0x18] sm:$0xff] }
  0x8c   :  { %v89_v36 = vsel %vm87_vm3, %v935_v34, %v79_v35  ;;  %v59_v37 = vpop.permute.xlu1 %58 }
  0x8d   :  { %1017 = vmatmul.mubr.msk.f32.vlgmr.msra.gmra.mrb[0].mxu0 %vm103_vm4, %v89_v36  ;;  %vm60_vm7 = vcmp.eq.s32.totalorder %v25_v24, %v59_v37  ;;  %v71_v45 = vpop.permute.xlu0 %70 }
  0x8e   :  { %1137 = vmatpush3.bf16.msra.mxu0 %v1310_v9  ;;  %v938_v38 = vsel %vm60_vm7, 1.0, %v1253_v18  ;;  %vm72_vm9 = vcmp.eq.s32.totalorder %v25_v24, %v71_v45 }
  0x8f   :  { %1138 = vmatprep.subr.bf16.mxu0 %v1249_v8  ;;  %v82_v39 = vrot.slane %v938_v38, 4  ;;  %v940_v47 = vsel %vm72_vm9, 1.0, %v1253_v18 }
  0x90   :  { %v85_v49 = vrot.slane %v940_v47, 4 }
  0x91   :  { %v53_v40 = vpop.permute.xlu1 %52 }
  0x92   :  { %1140 = vmatpush3.bf16.msra.mxu0 %v1326_v17  ;;  %vm54_vm8 = vcmp.eq.s32.totalorder %v25_v24, %v53_v40 }
  0x93   :  { %1147 = vmatprep.subr.bf16.mxu0 %v1249_v8  ;;  %v937_v41 = vsel %vm54_vm8, 1.0, %v1253_v18 }
  0x94   :  { %v90_v44 = vsel %vm87_vm3, %v937_v41, %v82_v39 }
  0x95   :  { %1019 = vmatprep.mubr.msk.f32.mxu0 %vm103_vm4, %v90_v44 }
  0x96   :  { %v65_v46 = vpop.permute.xlu1 %64 }
  0x97   :  { %vm66_vm10 = vcmp.eq.s32.totalorder %v25_v24, %v65_v46 }
  0x98   :  { %v939_v48 = vsel %vm66_vm10, 1.0, %v1253_v18 }
  0x99   :  { %v91_v50 = vsel %vm87_vm3, %v939_v48, %v85_v49 }
  0x9a   :  { %1020 = vmatmul.mubr.msk.f32.gmra.mrb[2].mxu0 %vm103_vm4, %v91_v50 }
  0x9b   :  { %1041 = vmatprep.mubr.msk.f32.mxu0 %vm1252_vm0, %v1253_v18 }
  0xe0   :  { %v274_v42 = vpop.f32.mrb[0].mxu1 }
  0xe1   :  { %v1032_v43 = vpop.f32.mrb[1].mxu1 }
 0x160   :  { %v1018_v52 = vpop.f32.mrb[0].mxu0 }
 0x161   :  { %v182_v53 = vpop.f32.mrb[1].mxu0  ;;  %v188_v1 = vadd.f32 %v1018_v52, %v1365_v51 }
 0x162   :  { %v183_v54 = vadd.f32 %v1365_v51, %v182_v53 }
 0x164   :  { %v278_v55 = vadd.f32 %v274_v42, %v183_v54 }
 0x166   :  { %1203 = vtanh.f32 %v278_v55 }
 0x16d   :  { %v1021_v57 = vpop.f32.mrb[2].mxu0 }
 0x16e   :  { %v192_v58 = vpop.f32.mrb[3].mxu0 }
 0x16f   :  { %v193_v14 = vadd.f32 %v1365_v51, %v192_v58 }
 0x170   :  { %v1204_v56 = vpop.eup %1203 }
 0x171   :  { %1042 = vmatmul.mubr.msk.f32.vlgmr.msra.gmra.mrb[4].mxu0 %vm103_vm4, %v1204_v56 }
 0x172   :  { %1149 = vmatpush3.bf16.msra.mxu0 %v1310_v9  ;;  %1063 = vmatprep.mubr.msk.f32.mxu0 %vm1252_vm0, %v1253_v18 }
 0x173   :  { %1150 = vmatprep.subr.bf16.mxu0 %v1249_v8 }
 0x176   :  { %1152 = vmatpush3.bf16.msra.mxu0 %v1326_v17 }
 0x177   :  { %1159 = vmatprep.subr.bf16.mxu0 %v1249_v8 }
 0x244   :  { %v349_v59 = vpop.f32.mrb[4].mxu0 }
 0x245   :  { %v354_v60 = vrot.slane %v349_v59, 4  ;;  %v1043_v61 = vpop.f32.mrb[5].mxu0 }
 0x247   :  { %v356_v62 = vadd.f32 %v354_v60, %v183_v54 }
 0x249   :  { %1205 = vtanh.f32 %v356_v62 }
 0x253   :  { %v1206_v63 = vpop.eup %1205 }
 0x254   :  { %v359_v0 = vrot.slane %v1206_v63, 4 }
 0x256   :  { %1053 = vmatmul.mubr.msk.f32.vlgmr.msra.gmra.mrb[2].mxu1 %vm103_vm4, %v359_v0 }
 0x257   :  { %1155 = vmatpush3.bf16.msra.mxu1 %v1310_v9  ;;  %1074 = vmatprep.mubr.msk.f32.mxu1 %vm1252_vm0, %v1253_v18 }
 0x258   :  { %1156 = vmatprep.subr.bf16.mxu1 %v1249_v8 }
 0x25b   :  { %1158 = vmatpush3.bf16.msra.mxu1 %v1326_v17 }
 0x25c   :  { %1165 = vmatprep.subr.bf16.mxu1 %v1249_v8 }
 0x329   :  { %v428_v2 = vpop.f32.mrb[2].mxu1 }
 0x32a   :  { %v432_v3 = vadd.f32 %v428_v2, %v188_v1  ;;  %v1054_v4 = vpop.f32.mrb[3].mxu1 }
 0x32c   :  { %1207 = vtanh.f32 %v432_v3 }
 0x336   :  { %v1208_v5 = vpop.eup %1207 }
 0x337   :  { %1064 = vmatmul.mubr.msk.f32.vlgmr.msra.gmra.mrb[6].mxu0 %vm103_vm4, %v1208_v5 }
 0x338   :  { %1161 = vmatpush3.bf16.msra.mxu0 %v1310_v9  ;;  %1085 = vmatprep.mubr.msk.f32.mxu0 %vm1252_vm0, %v1253_v18 }
 0x339   :  { %1162 = vmatprep.subr.bf16.mxu0 %v1249_v8 }
 0x33c   :  { %1164 = vmatpush3.bf16.msra.mxu0 %v1326_v17 }
 0x33d   :  { %1171 = vmatprep.subr.bf16.mxu0 %v1249_v8 }
 0x40a   :  { %v503_v6 = vpop.f32.mrb[6].mxu0 }
 0x40b   :  { %v508_v7 = vrot.slane %v503_v6, 4  ;;  %v1065_v10 = vpop.f32.mrb[7].mxu0 }
 0x40d   :  { %v510_v11 = vadd.f32 %v508_v7, %v188_v1 }
 0x40f   :  { %1209 = vtanh.f32 %v510_v11 }
 0x419   :  { %v1210_v12 = vpop.eup %1209 }
 0x41a   :  { %v513_v13 = vrot.slane %v1210_v12, 4 }
 0x41c   :  { %1075 = vmatmul.mubr.msk.f32.vlgmr.msra.gmra.mrb[4].mxu1 %vm103_vm4, %v513_v13 }
 0x41d   :  { %1167 = vmatpush3.bf16.msra.mxu1 %v1310_v9  ;;  %1096 = vmatprep.mubr.msk.f32.mxu1 %vm1252_vm0, %v1253_v18 }
 0x41e   :  { %1168 = vmatprep.subr.bf16.mxu1 %v1249_v8 }
 0x421   :  { %1170 = vmatpush3.bf16.msra.mxu1 %v1326_v17 }
 0x422   :  { %1177 = vmatprep.subr.bf16.mxu1 %v1249_v8 }
 0x4ef   :  { %v582_v15 = vpop.f32.mrb[4].mxu1 }
 0x4f0   :  { %v586_v16 = vadd.f32 %v582_v15, %v193_v14  ;;  %v1076_v19 = vpop.f32.mrb[5].mxu1 }
 0x4f2   :  { %1211 = vtanh.f32 %v586_v16 }
 0x4fc   :  { %v1212_v20 = vpop.eup %1211 }
 0x4fd   :  { %1086 = vmatmul.mubr.msk.f32.vlgmr.msra.gmra.mrb[8].mxu0 %vm103_vm4, %v1212_v20 }
 0x4fe   :  { %1173 = vmatpush3.bf16.msra.mxu0 %v1310_v9  ;;  %1107 = vmatprep.mubr.msk.f32.mxu0 %vm1252_vm0, %v1253_v18  ;;  %v198_v9 = vadd.f32 %v1021_v57, %v1365_v51 }
 0x4ff   :  { %1174 = vmatprep.subr.bf16.mxu0 %v1249_v8 }
 0x502   :  { %1176 = vmatpush3.bf16.msra.mxu0 %v1326_v17  ;;  %v820_v17 = vld [vmem:[%s1445_s4] sm:$0xff] }
 0x503   :  { %v1178_v32 = vpack.c.bf16 %v821_v31, %v820_v17 }
 0x5d0   :  { %v657_v21 = vpop.f32.mrb[8].mxu0 }
 0x5d1   :  { %v662_v22 = vrot.slane %v657_v21, 4  ;;  %v1087_v23 = vpop.f32.mrb[9].mxu0 }
 0x5d3   :  { %v664_v24 = vadd.f32 %v662_v22, %v193_v14 }
 0x5d5   :  { %1213 = vtanh.f32 %v664_v24 }
 0x5df   :  { %v1214_v25 = vpop.eup %1213 }
 0x5e0   :  { %v667_v26 = vrot.slane %v1214_v25, 4 }
 0x5e2   :  { %1097 = vmatmul.mubr.msk.f32.vlgmr.msra.gmra.mrb[6].mxu1 %vm103_vm4, %v667_v26 }
 0x5e3   :  { %1118 = vmatprep.mubr.msk.f32.mxu1 %vm1252_vm0, %v1253_v18  ;;  %1179 = vmatpush3.bf16.msra.mxu1 %v1178_v32  ;;  %v822_v18 = vld [vmem:[%s1445_s4 + $0x10] sm:$0xff]  ;;  %s1258_s4 = smov [#allocation2]  }
 0x5e4   :  { %1180 = vmatprep.subr.bf16.mxu1 %v1249_v8  ;;  %v1181_v34 = vpack.c.bf16 %v823_v33, %v822_v18  ;;  %v953_v8 = vld [vmem:[%s1446_s5] ss:$0 sm:$0xff]  ;;  %s925_s5 = sshll.u32 %s1258_s4, 4  ;;  %s926_s5 = int_to_ptr.vmem [resolvable:$true] %s925_s5 }
 0x5e5   :  { %s1223_s23 = scalar_lea.vmem %s926_s5, 64  ;;  %p1228_p1 = scmp.lt.s32.totalorder %s926_s5, %s926_s5 }
 0x5e6   :  { %p1224_p0 = scmp.ne.s32.totalorder %s926_s5, %s1223_s23  ;;  %p1229_p2 = scmp.lt.s32.totalorder %s1223_s23, %s1223_s23 }
 0x5e7   :  { %1182 = vmatpush3.bf16.msra.mxu1 %v1181_v34 }
 0x5e8   :  { %p1230_p3 = por %p1229_p2, %p1228_p1 }
 0x5ea   :  { %p1231_p4 = pnand %p1230_p3, %p1224_p0 }
 0x6b5   :  { %v736_v27 = vpop.f32.mrb[6].mxu1 }
 0x6b6   :  { %v740_v28 = vadd.f32 %v736_v27, %v198_v9  ;;  %v1098_v29 = vpop.f32.mrb[7].mxu1 }
 0x6b8   :  { %1215 = vtanh.f32 %v740_v28 }
 0x6c2   :  { %v1216_v30 = vpop.eup %1215 }
 0x6c3   :  { %1108 = vmatmul.mubr.msk.f32.vlgmr.msra.gmra.mrb[10].mxu0 %vm103_vm4, %v1216_v30 }
 0x796   :  { %v811_v35 = vpop.f32.mrb[10].mxu0 }
 0x797   :  { %v816_v36 = vrot.slane %v811_v35, 4  ;;  %v1109_v37 = vpop.f32.mrb[11].mxu0 }
 0x799   :  { %v818_v38 = vadd.f32 %v816_v36, %v198_v9 }
 0x79b   :  { %1217 = vtanh.f32 %v818_v38 }
 0x7a5   :  { %v1218_v39 = vpop.eup %1217 }
 0x7a6   :  { %v832_v40 = vrot.slane %v1218_v39, 4 }
 0x7a8   :  { %1119 = vmatmul.mubr.msk.f32.vlgmr.msra.gmra.mrb[8].mxu1 %vm103_vm4, %v832_v40 }
 0x87b   :  { %v901_v41 = vpop.f32.mrb[8].mxu1 }
 0x87c   :  { %v902_v42 = vadd.f32 %v953_v8, %v901_v41  ;;  %v1120_v43 = vpop.f32.mrb[9].mxu1 }
 0x87e   :  { %v905_v44 = vmax.f32 %v902_v42, 0.0 }
 0x880   :  { %v907_v45 = vsel %vm906_vm11, %v905_v44, -inf }
 0x881   :  { %908 = vmax.xlane.f32.xlu0 %v907_v45 }
 0x90e   :  { %v909_v46 = vpop.xlane.xlu0 %908 }
 0x90f   :  { %v910_v47 = vsub.f32 %v905_v44, %v909_v46 }
 0x911   :  { %v911_v48 = vmul.f32 1.442695, %v910_v47 }
 0x913   :  { %1219 = vpow2.f32 %v911_v48 }
 0x91d   :  { %v1220_v49 = vpop.eup %1219 }
 0x91e   :  { %v913_v50 = vsel %vm906_vm11, %v1220_v49, 0.0 }
 0x91f   :  { %914 = vadd.xlane.f32.xlu1 %v913_v50 }
 0x9ac   :  { %v915_v51 = vpop.xlane.xlu1 %914 }
 0x9ad   :  { %1221 = vrcp.f32 %v915_v51 }
 0x9b7   :  { %v1222_v52 = vpop.eup %1221 }
 0x9b8   :  { %v917_v53 = vmul.f32 %v1222_v52, %v1220_v49 }
 0x9ba   :  { %918 = vst.msk [vmem:[#allocation2] sm:$0xf] %vm906_vm11, %v917_v53 }
 0x9bb   :  { %1234 = shalt.err (!%p1231_p4)
}
 0x9bc   :  { %s1235_s26 = scalar_lea.hbm %s1447_s6, 64 }
 0x9bd   :  { %p1236_p5 = scmp.ne.s32.totalorder %s1447_s6, %s1235_s26  ;;  %p1239_p6 = scmp.lt.u32.totalorder %s1235_s26, %s1447_s6 }
 0x9bf   :  { %p1241_p7 = pnand %p1239_p6, %p1236_p5 }
 0x9c1   :  { %1244 = shalt.err (!%p1241_p7)
}
 0x9c2   :  { %928 = dma.vmem_to_hbm [thread:$0]  %s926_s5, 64, %s1447_s6, [#allocation3]  }
 0x9c3   :  { %1245 = dma.done.wait [#allocation3], 64  }
 0x9c4   :  { %1246 = vsyncadd [#allocation3], 4294967232 }
 0x9c5   :  { %932 = vsyncpa [#allocation3], 1 }

</bundles_post_ra>
